<compile_context>
chip_gen: v7x
topology: tpu7x:2x2x1
jax: 0.10.0
libtpu: 0.0.40
codegen_flags: <defaults>
</compile_context>

<pallas_src>
import jax
import jax.numpy as jnp
from jax.experimental import pallas as pl
from jax.experimental.pallas import tpu as pltpu


def attention_kernel(x_ref, w1_ref, b1_ref, w2_ref, out_ref, wts_ref):
    # x_ref  : (TB, T, H)  f32 encoder outputs for this batch block
    # w1_ref : (H, 2H)     bf16 first Linear weight, (in, out) layout  (resident)
    # b1_ref : (1, 2H)     f32 first Linear bias                       (resident)
    # w2_ref : (1, 2H)     f32 second Linear weight as a row vector    (resident)
    # out_ref: (TB, H)     attended outputs
    # wts_ref: (TB, T)     softmax attention weights (T on the lane axis)
    TB, T, H = x_ref.shape
    H2 = w1_ref.shape[1]

    x = x_ref[...]                                         # (TB, T, H) f32

    # ---- Linear(H, 2H) + ReLU: one MXU matmul over the whole batch block.
    # bf16 operands keep the MXU fast path on v6e/v7x; accumulation stays f32.
    x2d = x.reshape(TB * T, H).astype(jnp.bfloat16)
    h = jnp.dot(x2d, w1_ref[...], preferred_element_type=jnp.float32)
    h = jnp.maximum(h + b1_ref[...], 0.0)                  # (TB*T, 2H) f32

    # ---- Linear(2H, 1): VPU multiply + lane reduce (avoid an N=1 MXU pass).
    # The +b2 of the PyTorch module is dropped: softmax(e + c) == softmax(e).
    e = jnp.sum(h.reshape(TB, T, H2) * w2_ref[...], axis=-1)   # (TB, T), T on lanes

    # ---- softmax over the sequence axis, kept lane-dense in (TB, T):
    # the (TB, T, 1) sublane alternative would 8x the EUP/VPU op count for T=8.
    m = jnp.max(e, axis=-1, keepdims=True)                 # (TB, 1)
    p = jnp.exp(e - m)                                     # (TB, T)
    denom = jnp.sum(p, axis=-1, keepdims=True)             # (TB, 1)
    inv = pl.reciprocal(denom, approx=True)                # EUP slot (otherwise idle)
    inv = inv * (2.0 - denom * inv)                        # 1 Newton step -> full f32
    w = p * inv                                            # (TB, T)

    # ---- weighted sum over the sequence axis (elementwise on x + sublane reduce).
    # Single lane->sublane relayout of `w` happens here; x stays f32 for accuracy.
    out_ref[...] = jnp.sum(x * w[:, :, None], axis=1)      # (TB, H)
    wts_ref[...] = w                                       # (TB, T) lane-dense value


def _memory_budget():
    """Return (x-tile byte budget, VMEM capacity), generation-aware.

    128 MiB VMEM parts (v5e/v6e): ~4 MiB x tiles (total footprint ~30-50 MiB).
    64 MiB parts (v7x) or unknown: ~2 MiB x tiles (total ~16-25 MiB), well under
    the 32 MiB default scoped / 64 MiB physical limit."""
    vmem = 64 << 20  # conservative default (v7x-class)
    try:
        info = pltpu.get_tpu_info()
        vmem = int(getattr(info, "vmem_capacity_bytes", vmem))
    except Exception:
        pass
    if vmem >= (100 << 20):
        return 4 << 20, vmem
    return 2 << 20, vmem


def _pick_batch_tile(B, T, H, *, x_tile_budget_bytes, min_steps=4):
    """Choose (TB, Bp): batch tile and (possibly padded) batch size, Bp % TB == 0.

    TB is sized by the x-tile VMEM byte budget (this kernel is HBM-bound; tiny
    blocks pay ~0.35 us/step overhead against ~us-scale HBM time), kept a
    multiple of 8 (sublane alignment of the (TB, H)/(TB, T) output blocks)
    unless TB == Bp, and capped so the grid keeps >= min_steps steps when B is
    large enough (v7x megacore split + pipeline overlap).  If no well-sized
    exact divisor of B exists, B is padded up (pad rows are sliced off later)
    instead of falling back to one huge unpipelined block."""
    bytes_per_row = T * H * 4
    cap = max(1, x_tile_budget_bytes // bytes_per_row)
    if B >= 8 * min_steps:
        cap = min(cap, B // min_steps)
    if B <= 8:
        return B, B                       # single tiny block; TB == B keeps specs legal
    cap = max(8, (cap // 8) * 8)

    # Largest multiple-of-8 divisor of B within the cap (no padding needed).
    best = 0
    for tb in range(8, min(B, cap) + 1, 8):
        if B % tb == 0:
            best = tb
    if best >= max(8, cap // 2):
        return best, B

    # No reasonable exact divisor: pad the batch up to a multiple of a cap-sized tile.
    tb = min(cap, ((B + 7) // 8) * 8)
    bp = ((B + tb - 1) // tb) * tb
    return tb, bp


def attention_forward(x, w1, b1, w2, b2):
    """x: (B, T, H) f32; w1: (H, 2H); b1: (2H,); w2: (2H, 1); b2: (1,).
    Returns (outputs (B, H), weights (B, T)) — same semantics as the PyTorch module.
    Note: b2 is accepted for API parity but is mathematically inert (softmax shift)."""
    del b2  # softmax(e + b2) == softmax(e): the second Linear's bias cannot matter.
    B, T, H = x.shape
    H2 = w1.shape[1]

    x_budget, vmem_capacity = _memory_budget()
    TB, Bp = _pick_batch_tile(B, T, H, x_tile_budget_bytes=x_budget, min_steps=4)

    x_in = x if Bp == B else jnp.pad(x, ((0, Bp - B), (0, 0), (0, 0)))

    w1_bf = w1.astype(jnp.bfloat16)            # MXU fast path; resident in VMEM
    b1_2d = b1.reshape(1, H2).astype(jnp.float32)
    w2_row = w2.reshape(1, H2).astype(jnp.float32)   # (2H,1) -> (1,2H) row for the lane reduce

    # Per-step VMEM footprint: double-buffered x tile + f32 `h` intermediate
    # (2x the x tile) + the h*w2 product + double-buffered small outputs + weights.
    x_tile_bytes = TB * T * H * 4
    footprint = (8 * x_tile_bytes                 # 2x x (dbl-buf) + h + h*w2 product
                 + 2 * TB * (H + T) * 4           # double-buffered output blocks
                 + (H * H2 * 2 + 2 * H2 * 4 * 2))  # resident weights/biases
    vmem_limit = int(min(max(footprint * 3 // 2, 32 << 20), (vmem_capacity * 3) // 4))

    outputs, weights = pl.pallas_call(
        attention_kernel,
        out_shape=(
            jax.ShapeDtypeStruct((Bp, H), jnp.float32),
            jax.ShapeDtypeStruct((Bp, T), jnp.float32),
        ),
        grid_spec=pltpu.PrefetchScalarGridSpec(
            num_scalar_prefetch=0,
            grid=(Bp // TB,),
            in_specs=[
                pl.BlockSpec((TB, T, H), lambda b: (b, 0, 0)),
                pl.BlockSpec((H, H2), lambda b: (0, 0)),
                pl.BlockSpec((1, H2), lambda b: (0, 0)),
                pl.BlockSpec((1, H2), lambda b: (0, 0)),
            ],
            out_specs=[
                pl.BlockSpec((TB, H), lambda b: (b, 0)),
                pl.BlockSpec((TB, T), lambda b: (b, 0)),
            ],
        ),
        compiler_params=pltpu.CompilerParams(
            dimension_semantics=("parallel",),
            vmem_limit_bytes=vmem_limit,
        ),
    )(x_in, w1_bf, b1_2d, w2_row)

    if Bp != B:
        outputs = outputs[:B]
        weights = weights[:B]
    return outputs, weights


def attention_reference(x, w1, b1, w2, b2, *, mxu_bf16_inputs=False):
    """Plain-JAX reference. With mxu_bf16_inputs=True the first Linear's operands
    are rounded to bf16 (then computed in f32), matching the kernel's MXU path."""
    if mxu_bf16_inputs:
        xl = x.astype(jnp.bfloat16).astype(jnp.float32)
        w1l = w1.astype(jnp.bfloat16).astype(jnp.float32)
    else:
        xl, w1l = x, w1
    h = jax.nn.relu(jnp.einsum("bth,hk->btk", xl, w1l,
                               precision=jax.lax.Precision.HIGHEST) + b1)
    e = (jnp.einsum("btk,ko->bto", h, w2,
                    precision=jax.lax.Precision.HIGHEST) + b2)[..., 0]   # (B, T)
    w = jax.nn.softmax(e, axis=1)
    out = jnp.sum(x * w[..., None], axis=1)
    return out, w


if __name__ == "__main__":
    B, T, H = 2, 8, 32   # batch, seq, hidden_dim

    key = jax.random.PRNGKey(0)
    kx, k1, kb1, k2, kb2 = jax.random.split(key, 5)

    # deterministic parameter init (PyTorch-style uniform +-1/sqrt(fan_in))
    s1 = 1.0 / jnp.sqrt(H)
    s2 = 1.0 / jnp.sqrt(2 * H)
    w1 = jax.random.uniform(k1, (H, 2 * H), jnp.float32, -s1, s1)
    b1 = jax.random.uniform(kb1, (2 * H,), jnp.float32, -s1, s1)
    w2 = jax.random.uniform(k2, (2 * H, 1), jnp.float32, -s2, s2)
    b2 = jax.random.uniform(kb2, (1,), jnp.float32, -s2, s2)

    x = jax.random.normal(kx, (B, T, H), jnp.float32)

    outputs, weights = attention_forward(x, w1, b1, w2, b2)
    outputs = jax.block_until_ready(outputs)
    weights = jax.block_until_ready(weights)

    assert outputs.shape == (B, H) and weights.shape == (B, T)

    # Tight check against the matched-precision reference (only MXU accumulation
    # order and the Newton-refined EUP reciprocal differ).
    ref_out, ref_w = attention_reference(x, w1, b1, w2, b2, mxu_bf16_inputs=True)
    assert jnp.allclose(outputs, ref_out, atol=1e-4, rtol=1e-4)
    assert jnp.allclose(weights, ref_w, atol=1e-4, rtol=1e-4)

    # Sanity check against the pure-f32 reference (loosened for the bf16 operand
    # rounding of the first Linear on the MXU fast path).
    f32_out, f32_w = attention_reference(x, w1, b1, w2, b2)
    assert jnp.allclose(outputs, f32_out, atol=5e-2, rtol=5e-2)
    assert jnp.allclose(weights, f32_w, atol=5e-2, rtol=5e-2)

    assert jnp.allclose(jnp.sum(weights, axis=1), 1.0, atol=1e-5)

    print("KERNEL_OK")
</pallas_src>

<mosaic_0001>
module attributes {stable_mosaic.version = 11 : i64} {
  func.func @attention_kernel(%arg0: i32, %arg1: memref<2x8x32xf32, #tpu.memory_space<vmem>>, %arg2: memref<32x64xbf16, #tpu.memory_space<vmem>>, %arg3: memref<1x64xf32, #tpu.memory_space<vmem>>, %arg4: memref<1x64xf32, #tpu.memory_space<vmem>>, %arg5: memref<2x32xf32, #tpu.memory_space<vmem>>, %arg6: memref<2x8xf32, #tpu.memory_space<vmem>>) attributes {dimension_semantics = [#tpu.dimension_semantics<parallel>], iteration_bounds = array<i64: 1>, scalar_prefetch = 0 : i64, scratch_operands = 0 : i64, tpu.core_type = #tpu.core_type<tc>, window_params = [{transform_indices = @transform_0, window_bounds = array<i64: 2, 8, 32>}, {pipeline_mode = #tpu.pipeline_mode<synchronous>, transform_indices = @transform_1, window_bounds = array<i64: 32, 64>}, {pipeline_mode = #tpu.pipeline_mode<synchronous>, transform_indices = @transform_2, window_bounds = array<i64: 1, 64>}, {pipeline_mode = #tpu.pipeline_mode<synchronous>, transform_indices = @transform_3, window_bounds = array<i64: 1, 64>}, {transform_indices = @transform_4, window_bounds = array<i64: 2, 32>}, {transform_indices = @transform_5, window_bounds = array<i64: 2, 8>}]} {
    %c0 = arith.constant 0 : index
    %c0_0 = arith.constant 0 : index
    %c0_1 = arith.constant 0 : index
    %0 = vector.load %arg1[%c0, %c0_0, %c0_1] : memref<2x8x32xf32, #tpu.memory_space<vmem>>, vector<2x8x32xf32>
    %1 = vector.shape_cast %0 : vector<2x8x32xf32> to vector<16x32xf32>
    %2 = arith.truncf %1 : vector<16x32xf32> to vector<16x32xbf16>
    %c0_2 = arith.constant 0 : index
    %c0_3 = arith.constant 0 : index
    %3 = vector.load %arg2[%c0_2, %c0_3] : memref<32x64xbf16, #tpu.memory_space<vmem>>, vector<32x64xbf16>
    %cst = arith.constant dense<0.000000e+00> : vector<16x64xf32>
    %4 = tpu.matmul %2, %3, %cst {dimension_numbers = #tpu.dot_dimension_numbers<[1], [0], [0], [1], [0, 0, 1, 1], [], []>} : vector<16x32xbf16>, vector<32x64xbf16>, vector<16x64xf32> -> vector<16x64xf32>
    %c0_4 = arith.constant 0 : index
    %c0_5 = arith.constant 0 : index
    %5 = vector.load %arg3[%c0_4, %c0_5] : memref<1x64xf32, #tpu.memory_space<vmem>>, vector<1x64xf32>
    %6 = vector.broadcast %5 : vector<1x64xf32> to vector<16x64xf32>
    %7 = arith.addf %4, %6 : vector<16x64xf32>
    %cst_6 = arith.constant 0.000000e+00 : f32
    %8 = vector.broadcast %cst_6 : f32 to vector<16x64xf32>
    %9 = arith.maximumf %7, %8 : vector<16x64xf32>
    %10 = vector.shape_cast %9 : vector<16x64xf32> to vector<2x8x64xf32>
    %c0_7 = arith.constant 0 : index
    %c0_8 = arith.constant 0 : index
    %11 = vector.load %arg4[%c0_7, %c0_8] : memref<1x64xf32, #tpu.memory_space<vmem>>, vector<1x64xf32>
    %12 = vector.shape_cast %11 : vector<1x64xf32> to vector<1x1x64xf32>
    %13 = vector.broadcast %12 : vector<1x1x64xf32> to vector<2x8x64xf32>
    %14 = arith.mulf %10, %13 : vector<2x8x64xf32>
    %cst_9 = arith.constant dense<0.000000e+00> : vector<2x8xf32>
    %15 = vector.multi_reduction <add>, %14, %cst_9 [2] : vector<2x8x64xf32> to vector<2x8xf32>
    %cst_10 = arith.constant dense<0xFF800000> : vector<2xf32>
    %16 = vector.multi_reduction <maximumf>, %15, %cst_10 [1] : vector<2x8xf32> to vector<2xf32>
    %17 = vector.shape_cast %16 : vector<2xf32> to vector<2x1xf32>
    %18 = vector.broadcast %17 : vector<2x1xf32> to vector<2x8xf32>
    %19 = arith.subf %15, %18 : vector<2x8xf32>
    %20 = math.exp %19 : vector<2x8xf32>
    %cst_11 = arith.constant dense<0.000000e+00> : vector<2xf32>
    %21 = vector.multi_reduction <add>, %20, %cst_11 [1] : vector<2x8xf32> to vector<2xf32>
    %22 = vector.shape_cast %21 : vector<2xf32> to vector<2x1xf32>
    %23 = tpu.reciprocal %22 {approx = true} : vector<2x1xf32> -> vector<2x1xf32>
    %24 = arith.mulf %22, %23 : vector<2x1xf32>
    %cst_12 = arith.constant 2.000000e+00 : f32
    %25 = vector.broadcast %cst_12 : f32 to vector<2x1xf32>
    %26 = arith.subf %25, %24 : vector<2x1xf32>
    %27 = arith.mulf %23, %26 : vector<2x1xf32>
    %28 = vector.broadcast %27 : vector<2x1xf32> to vector<2x8xf32>
    %29 = arith.mulf %20, %28 : vector<2x8xf32>
    %30 = vector.shape_cast %29 : vector<2x8xf32> to vector<2x8x1xf32>
    %31 = vector.broadcast %30 : vector<2x8x1xf32> to vector<2x8x32xf32>
    %32 = arith.mulf %0, %31 : vector<2x8x32xf32>
    %cst_13 = arith.constant dense<0.000000e+00> : vector<2x32xf32>
    %33 = vector.multi_reduction <add>, %32, %cst_13 [1] : vector<2x8x32xf32> to vector<2x32xf32>
    %c0_14 = arith.constant 0 : index
    %c0_15 = arith.constant 0 : index
    %34 = vector.load %arg5[%c0_14, %c0_15] : memref<2x32xf32, #tpu.memory_space<vmem>>, vector<2x32xf32>
    tpu.vector_store %arg5[%c0_14, %c0_15], %33 {strides = array<i32>} : memref<2x32xf32, #tpu.memory_space<vmem>>, vector<2x32xf32>,
    %c0_16 = arith.constant 0 : index
    %c0_17 = arith.constant 0 : index
    %35 = vector.load %arg6[%c0_16, %c0_17] : memref<2x8xf32, #tpu.memory_space<vmem>>, vector<2x8xf32>
    tpu.vector_store %arg6[%c0_16, %c0_17], %29 {strides = array<i32>} : memref<2x8xf32, #tpu.memory_space<vmem>>, vector<2x8xf32>,
    return
  }
  func.func @transform_0(%arg0: i32) -> (i32, i32, i32) {
    %c0_i32 = arith.constant 0 : i32
    %c0_i32_0 = arith.constant 0 : i32
    %c0_i32_1 = arith.constant 0 : i32
    return %arg0, %c0_i32, %c0_i32_0 : i32, i32, i32
  }
  func.func @transform_1(%arg0: i32) -> (i32, i32) {
    %c0_i32 = arith.constant 0 : i32
    %c0_i32_0 = arith.constant 0 : i32
    %c0_i32_1 = arith.constant 0 : i32
    return %c0_i32, %c0_i32_0 : i32, i32
  }
  func.func @transform_2(%arg0: i32) -> (i32, i32) {
    %c0_i32 = arith.constant 0 : i32
    %c0_i32_0 = arith.constant 0 : i32
    %c0_i32_1 = arith.constant 0 : i32
    return %c0_i32, %c0_i32_0 : i32, i32
  }
  func.func @transform_3(%arg0: i32) -> (i32, i32) {
    %c0_i32 = arith.constant 0 : i32
    %c0_i32_0 = arith.constant 0 : i32
    %c0_i32_1 = arith.constant 0 : i32
    return %c0_i32, %c0_i32_0 : i32, i32
  }
  func.func @transform_4(%arg0: i32) -> (i32, i32) {
    %c0_i32 = arith.constant 0 : i32
    %c0_i32_0 = arith.constant 0 : i32
    return %arg0, %c0_i32 : i32, i32
  }
  func.func @transform_5(%arg0: i32) -> (i32, i32) {
    %c0_i32 = arith.constant 0 : i32
    %c0_i32_0 = arith.constant 0 : i32
    return %arg0, %c0_i32 : i32, i32
  }
}

</mosaic_0001>

<bundles_post_ra>
// kernel: tpu_custom_call.1
= control target key start
LH: loop header
LB: loop body
LE: loop exit
PB: predicated region body
PF: predicated region fallthrough
CT: control target
= control target key end

     0   :  { %11 = vsyncpa [#allocation3], 0  ;;  %s532_s0 = inlined_call_operand.hbm [shape: f32[2,8,32], index: 0, kind: input, shape index: {}]   ;;  %s533_s1 = inlined_call_operand.hbm [shape: bf16[32,64], index: 1, kind: input, shape index: {}]   ;;  %s534_s2 = inlined_call_operand.vmem [shape: f32[1,64], index: 2, kind: input, shape index: {}]   ;;  %s535_s3 = inlined_call_operand.vmem [shape: f32[1,64], index: 3, kind: input, shape index: {}]   ;;  %s536_s4 = inlined_call_operand.hbm [shape: f32[2,32], index: 4, kind: output, shape index: {0}]   ;;  %s537_s5 = inlined_call_operand.hbm [shape: f32[2,8], index: 5, kind: output, shape index: {1}]  }
   0x1   :  { %12 = vsyncpa [#allocation6], 0 }
   0x2   :  { %13 = vsyncpa [#allocation4], 0 }
   0x3   :  { %14 = vsyncpa [#allocation9], 0  ;;  %s419_s18 = smov [#allocation2]   ;;  %s323_s22 = scalar_lea.hbm %s532_s0, 256 }
   0x4   :  { %s20_s19 = sshll.u32 %s419_s18, 4  ;;  %p324_p0 = scmp.ne.s32.totalorder %s532_s0, %s323_s22  ;;  %s21_s19 = int_to_ptr.vmem [resolvable:$true] %s20_s19 }
   0x5   :  { %p327_p1 = scmp.lt.u32.totalorder %s323_s22, %s532_s0 }
   0x7   :  { %p329_p2 = pnand %p327_p1, %p324_p0 }
   0x9   :  { %332 = shalt.err (!%p329_p2)
}
   0xa   :  { %s333_s27 = scalar_lea.vmem %s21_s19, 256  ;;  %p338_p4 = scmp.lt.s32.totalorder %s21_s19, %s21_s19 }
   0xb   :  { %p334_p3 = scmp.ne.s32.totalorder %s21_s19, %s333_s27  ;;  %p339_p5 = scmp.lt.s32.totalorder %s333_s27, %s333_s27 }
   0xd   :  { %p340_p6 = por %p339_p5, %p338_p4 }
   0xf   :  { %p341_p7 = pnand %p340_p6, %p334_p3 }
  0x11   :  { %344 = shalt.err (!%p341_p7)
}
  0x12   :  { %s420_s28 = smov 128   ;;  %s421_s29 = smov 8  }
  0x13   :  { %26 = dma.hbm_to_vmem [thread:$0]  %s532_s0, 256, %s21_s19, [#allocation3], %s420_s28, %s420_s28, %s421_s29  }
  0x14   :  { %s422_s7 = smov [#allocation5]   ;;  %s345_s11 = scalar_lea.hbm %s533_s1, 256 }
  0x15   :  { %s32_s8 = sshll.u32 %s422_s7, 4  ;;  %p346_p8 = scmp.ne.s32.totalorder %s533_s1, %s345_s11  ;;  %s33_s8 = int_to_ptr.vmem [resolvable:$true] %s32_s8 }
  0x16   :  { %p349_p9 = scmp.lt.u32.totalorder %s345_s11, %s533_s1 }
  0x18   :  { %p351_p10 = pnand %p349_p9, %p346_p8 }
  0x1a   :  { %354 = shalt.err (!%p351_p10)
}
  0x1b   :  { %s355_s16 = scalar_lea.vmem %s33_s8, 256  ;;  %p360_p12 = scmp.lt.s32.totalorder %s33_s8, %s33_s8 }
  0x1c   :  { %p356_p11 = scmp.ne.s32.totalorder %s33_s8, %s355_s16  ;;  %p361_p13 = scmp.lt.s32.totalorder %s355_s16, %s355_s16 }
  0x1e   :  { %p362_p0 = por %p361_p13, %p360_p12 }
  0x20   :  { %p363_p1 = pnand %p362_p0, %p356_p11 }
  0x22   :  { %366 = shalt.err (!%p363_p1)
}
  0x23   :  { %s423_s0 = smov 64   ;;  %s424_s17 = smov 4  }
  0x24   :  { %38 = dma.hbm_to_vmem [thread:$0]  %s533_s1, 256, %s33_s8, [#allocation6], %s423_s0, %s423_s0, %s424_s17  }
  0x25   :  { %411 = dma.done.wait [#allocation3], 256  }
  0x26   :  { %412 = vsyncadd [#allocation3], 4294967040 }
  0x27   :  { %413 = dma.done.wait [#allocation6], 256  }
  0x28   :  { %414 = vsyncadd [#allocation6], 4294967040  ;;  %v425_v0 = vmov 0.0   ;;  %vm426_vm0 = vmmov 0   ;;  %v315_v1 = vld [vmem:[#allocation5] sm:$0xff]   ;;  %v316_v2 = vld [vmem:[#allocation5 + $0x8] sm:$0xff]   ;;  %v141_v20 = vlaneseq }
  0x29   :  { %294 = vmatprep.subr.bf16.mxu0 %v425_v0  ;;  %298 = vmatprep.mubr.msk.bf16.mxu0 %vm426_vm0, %v425_v0  ;;  %v484_v3 = vld [vmem:[#allocation2] sm:$0xff]  ;;  %v486_v4 = vld [vmem:[#allocation2 + $0x8] sm:$0xff]  ;;  %vm76_vm1 = vcmask 261120   ;;  %vm132_vm2 = vcmask 523264   ;;  %vm151_vm3 = vcmask 1041409   ;;  %vm154_vm4 = vcmask 58368  }
  0x2a   :  { %295 = vmatpush3.bf16.msra.mxu0 %v315_v1  ;;  %v52_v5 = vpack.c.bf16 %v486_v4, %v484_v3  ;;  %v286_v6 = vld [vmem:[%s534_s2] ss:$0 sm:$0xff]  ;;  %v142_v21 = vand.u32 127, %v141_v20  ;;  %v144_v22 = vshrl.u32 %v141_v20, 7  ;;  %v427_v30 = vmov 0   ;;  %s428_s2 = smov [#allocation8]  }
  0x2b   :  { %296 = vmatprep.subr.bf16.mxu0 %v425_v0  ;;  %v290_v11 = vld [vmem:[%s535_s3] ss:$0 sm:$0xff]  ;;  %314 = vset.pattern.permute.xlu0 %v427_v30  ;;  %s272_s3 = sshll.u32 %s428_s2, 4  ;;  %s273_s3 = int_to_ptr.vmem [resolvable:$true] %s272_s3 }
  0x2c   :  { %v145_v24 = vsub.s32 %v142_v21, %v144_v22  ;;  %313 = vset.pattern.permute.xlu1 %v427_v30  ;;  %v161_v31 = vsub.s32 0, %v144_v22  ;;  %v165_v32 = vsub.s32 1, %v144_v22  ;;  %s367_s23 = scalar_lea.vmem %s273_s3, 32  ;;  %p372_p3 = scmp.lt.s32.totalorder %s273_s3, %s273_s3 }
  0x2d   :  { %p368_p2 = scmp.ne.s32.totalorder %s273_s3, %s367_s23  ;;  %p373_p4 = scmp.lt.s32.totalorder %s367_s23, %s367_s23 }
  0x2e   :  { %297 = vmatpush3.bf16.msra.mxu0 %v316_v2 }
  0x2f   :  { %p374_p5 = por %p373_p4, %p372_p3 }
  0x31   :  { %299 = vmatmul.mubr.msk.bf16.vlgmr.msra.gmra.mrb[0].mxu0 %vm76_vm1, %v52_v5  ;;  %p375_p6 = pnand %p374_p5, %p368_p2 }
 0x104   :  { %v114_v7 = vpop.f32.mrb[0].mxu0 }
 0x105   :  { %v115_v8 = vadd.f32 %v286_v6, %v114_v7  ;;  %v300_v9 = vpop.f32.mrb[1].mxu0 }
 0x106   :  { %v117_v10 = vpop.f32.mrb[2].mxu0 }
 0x107   :  { %v121_v12 = vmax.f32 %v115_v8, 0.0  ;;  %v118_v13 = vadd.f32 %v286_v6, %v117_v10  ;;  %v301_v14 = vpop.f32.mrb[3].mxu0 }
 0x109   :  { %v122_v15 = vmax.f32 %v118_v13, 0.0  ;;  %v130_v16 = vmul.f32 %v290_v11, %v121_v12 }
 0x10b   :  { %v133_v17 = vsel %vm132_vm2, %v130_v16, 0.0  ;;  %v131_v18 = vmul.f32 %v290_v11, %v122_v15 }
 0x10c   :  { %134 = vadd.xlane.f32.xlu0 %v133_v17 }
 0x10d   :  { %v136_v19 = vsel %vm132_vm2, %v131_v18, 0.0 }
 0x110   :  { %137 = vadd.xlane.f32.xlu0 %v136_v19 }
 0x199   :  { %v135_v23 = vpop.xlane.xlu0 %134 }
 0x19a   :  { %v146_v26 = vrot.slane %v135_v23, %v145_v24 }
 0x19d   :  { %v138_v25 = vpop.xlane.xlu0 %137 }
 0x19e   :  { %v150_v27 = vrot.slane %v138_v25, %v145_v24 }
 0x1a0   :  { %v152_v28 = vsel %vm151_vm3, %v150_v27, %v146_v26 }
 0x1a1   :  { %v155_v29 = vsel %vm154_vm4, %v152_v28, -inf }
 0x1a2   :  { %156 = vmax.xlane.f32.xlu1 %v155_v29 }
 0x22f   :  { %v157_v33 = vpop.xlane.xlu1 %156 }
 0x230   :  { %v162_v34 = vrot.slane %v157_v33, %v161_v31  ;;  %v166_v35 = vrot.slane %v157_v33, %v165_v32 }
 0x232   :  { %v169_v36 = vsub.f32 %v135_v23, %v162_v34  ;;  %v170_v37 = vsub.f32 %v138_v25, %v166_v35 }
 0x234   :  { %v171_v38 = vmul.f32 1.442695, %v169_v36  ;;  %v173_v39 = vmul.f32 1.442695, %v170_v37 }
 0x236   :  { %317 = vpow2.f32 %v171_v38 }
 0x237   :  { %319 = vpow2.f32 %v173_v39 }
 0x240   :  { %v318_v40 = vpop.eup %317 }
 0x241   :  { %v320_v41 = vpop.eup %319  ;;  %178 = vperm.xlu1 %313, %v318_v40  }
 0x242   :  { %181 = vperm.xlu0 %314, %v320_v41  }
 0x2c0   :  { %v179_v42 = vpop.permute.xlu1 %178 }
 0x2c1   :  { %v182_v43 = vpop.permute.xlu0 %181  ;;  %v186_v44 = vrot.slane %v179_v42, %v145_v24 }
 0x2c2   :  { %v190_v45 = vrot.slane %v182_v43, %v145_v24 }
 0x2c4   :  { %v191_v46 = vsel %vm151_vm3, %v190_v45, %v186_v44 }
 0x2c5   :  { %v193_v47 = vsel %vm154_vm4, %v191_v46, 0.0 }
 0x2c6   :  { %194 = vadd.xlane.f32.xlu1 %v193_v47 }
 0x353   :  { %v195_v48 = vpop.xlane.xlu1 %194 }
 0x354   :  { %321 = vrcp.f32 %v195_v48 }
 0x35e   :  { %v322_v49 = vpop.eup %321 }
 0x35f   :  { %v197_v50 = vmul.f32 %v322_v49, %v195_v48 }
 0x361   :  { %v198_v51 = vsub.f32 2.0, %v197_v50 }
 0x363   :  { %v199_v52 = vmul.f32 %v322_v49, %v198_v51 }
 0x365   :  { %v204_v53 = vrot.slane %v199_v52, %v161_v31  ;;  %v208_v54 = vrot.slane %v199_v52, %v165_v32 }
 0x367   :  { %v211_v55 = vmul.f32 %v318_v40, %v204_v53  ;;  %v212_v56 = vmul.f32 %v320_v41, %v208_v54 }
 0x369   :  { %215 = vperm.xlu0 %314, %v211_v55  }
 0x36d   :  { %220 = vperm.xlu0 %314, %v212_v56  }
 0x3e8   :  { %v216_v57 = vpop.permute.xlu0 %215 }
 0x3e9   :  { %v223_v58 = vmul.f32 %v216_v57, %v484_v3  ;;  %v248_v62 = vrot.slane %v216_v57, %v145_v24 }
 0x3eb   :  { %v225_v59 = vsel %vm76_vm1, %v223_v58, 0.0 }
 0x3ec   :  { %v226_v60 = vrot.slane %v225_v59, 4  ;;  %v221_v61 = vpop.permute.xlu0 %220 }
 0x3ed   :  { %v224_v63 = vmul.f32 %v221_v61, %v486_v4  ;;  %v252_v0 = vrot.slane %v221_v61, %v145_v24 }
 0x3ee   :  { %v227_v1 = vadd.f32 %v226_v60, %v225_v59 }
 0x3ef   :  { %v232_v2 = vsel %vm76_vm1, %v224_v63, 0.0  ;;  %v253_v5 = vsel %vm151_vm3, %v252_v0, %v248_v62 }
 0x3f0   :  { %v228_v6 = vrot.slane %v227_v1, 2  ;;  %v233_v7 = vrot.slane %v232_v2, 4  ;;  %255 = vst.msk [vmem:[#allocation8] sm:$0x3] %vm154_vm4, %v253_v5 }
 0x3f1   :  { %378 = shalt.err (!%p375_p6)
}
 0x3f2   :  { %s379_s26 = scalar_lea.hbm %s537_s5, 32 }
 0x3f3   :  { %p380_p7 = scmp.ne.s32.totalorder %s537_s5, %s379_s26  ;;  %p383_p8 = scmp.lt.u32.totalorder %s379_s26, %s537_s5 }
 0x3f5   :  { %p385_p9 = pnand %p383_p8, %p380_p7 }
 0x3f7   :  { %388 = shalt.err (!%p385_p9)
}
 0x3f8   :  { %275 = dma.vmem_to_hbm [thread:$0]  %s273_s3, 32, %s537_s5, [#allocation9]   ;;  %v229_v3 = vadd.f32 %v228_v6, %v227_v1  ;;  %v234_v4 = vadd.f32 %v233_v7, %v232_v2  ;;  %vm243_vm5 = vcmask 254976  }
 0x3f9   :  { %s429_s8 = smov [#allocation7]  }
 0x3fa   :  { %v235_v8 = vrot.slane %v234_v4, 2  ;;  %v230_v9 = vrot.slane %v229_v3, 1  ;;  %s262_s9 = sshll.u32 %s429_s8, 4  ;;  %s263_s9 = int_to_ptr.vmem [resolvable:$true] %s262_s9 }
 0x3fb   :  { %s389_s10 = scalar_lea.vmem %s263_s9, 32  ;;  %p394_p11 = scmp.lt.s32.totalorder %s263_s9, %s263_s9 }
 0x3fc   :  { %v236_v10 = vadd.f32 %v235_v8, %v234_v4  ;;  %v231_v13 = vadd.f32 %v230_v9, %v229_v3  ;;  %p390_p10 = scmp.ne.s32.totalorder %s263_s9, %s389_s10  ;;  %p395_p12 = scmp.lt.s32.totalorder %s389_s10, %s389_s10 }
 0x3fe   :  { %v237_v11 = vrot.slane %v236_v10, 1  ;;  %p396_p13 = por %p395_p12, %p394_p11 }
 0x400   :  { %v238_v12 = vadd.f32 %v237_v11, %v236_v10  ;;  %p397_p0 = pnand %p396_p13, %p390_p10 }
 0x402   :  { %v241_v14 = vsel %vm151_vm3, %v238_v12, %v231_v13 }
 0x403   :  { %244 = vst.msk [vmem:[#allocation7] sm:$0x3] %vm243_vm5, %v241_v14 }
 0x404   :  { %400 = shalt.err (!%p397_p0)
}
 0x405   :  { %s401_s12 = scalar_lea.hbm %s536_s4, 32 }
 0x406   :  { %p402_p1 = scmp.ne.s32.totalorder %s536_s4, %s401_s12  ;;  %p405_p2 = scmp.lt.u32.totalorder %s401_s12, %s536_s4 }
 0x408   :  { %p407_p3 = pnand %p405_p2, %p402_p1 }
 0x40a   :  { %410 = shalt.err (!%p407_p3)
}
 0x40b   :  { %265 = dma.vmem_to_hbm [thread:$0]  %s263_s9, 32, %s536_s4, [#allocation4]  }
 0x40c   :  { %415 = dma.done.wait [#allocation4], 32  }
 0x40d   :  { %416 = vsyncadd [#allocation4], 4294967264 }
 0x40e   :  { %417 = dma.done.wait [#allocation9], 32  }
 0x40f   :  { %418 = vsyncadd [#allocation9], 4294967264 }
 0x410   :  { %282 = vsyncpa [#allocation3], 1 }
 0x411   :  { %283 = vsyncpa [#allocation6], 1 }
 0x412   :  { %284 = vsyncpa [#allocation4], 1 }
 0x413   :  { %285 = vsyncpa [#allocation9], 1 }

</bundles_post_ra>
